<compile_context>
chip_gen: v6e
topology: v6e:2x2x1
jax: 0.10.0
libtpu: 0.0.40
codegen_flags: <defaults>
</compile_context>

<pallas_src>
import jax
import jax.numpy as jnp
from jax.experimental import pallas as pl
from jax.experimental.pallas import tpu as pltpu


LANE = 128      # TPU lane width (last-dim tiling unit)
SUBLANE = 8     # TPU sublane width (second-to-last-dim tiling unit)


def _round_up(n, m):
    return (n + m - 1) // m * m


def _tpu_info():
    try:
        return pltpu.get_tpu_info()
    except Exception:
        return None


def _num_tensorcores(info):
    """Best-effort TensorCore-per-chip count (v7x=2, v5e/v6e=1)."""
    if info is None:
        return 1
    for attr in ("num_cores", "core_count", "num_tensorcores",
                 "tensorcore_count", "num_tc"):
        v = getattr(info, attr, None)
        if isinstance(v, int) and v > 0:
            return v
    return 1


def _vmem_capacity_bytes(info):
    v = getattr(info, "vmem_capacity_bytes", None) if info is not None else None
    if isinstance(v, int) and v > 0:
        return v
    return 64 * 1024 * 1024   # conservative default (v7x per-TC VMEM)


def ff_kernel(x_ref, wcat_ref, bcat_ref, w2_ref, b2_ref, w3_ref, b3_ref, o_ref):
    """One row-tile of: ReLU(L3(ReLU(L2(ReLU(L1(x)))))) + L_shortcut(x).

    L1 and the shortcut are fused into one [Dp, 2*Dp] matmul (same LHS x).
    Matmul inputs are bf16 (MXU-native); accumulation is f32.
    """
    Dp = w2_ref.shape[0]
    cd = wcat_ref.dtype
    x = x_ref[...].astype(cd)                           # in-kernel cast (VPU)

    # Fused layer-1 + shortcut: (tm, Dp) @ (Dp, 2*Dp) -> (tm, 2*Dp) f32.
    h0 = jnp.dot(x, wcat_ref[...],
                 preferred_element_type=jnp.float32) + bcat_ref[...]
    h = jnp.maximum(h0[:, :Dp], 0.0).astype(cd)         # layer-1 activations
    s = h0[:, Dp:].astype(cd)                           # shortcut, bf16 live across L2/L3

    h = jnp.dot(h, w2_ref[...],
                preferred_element_type=jnp.float32) + b2_ref[...]
    h = jnp.maximum(h, 0.0).astype(cd)

    h = jnp.dot(h, w3_ref[...],
                preferred_element_type=jnp.float32) + b3_ref[...]
    h = jnp.maximum(h, 0.0)

    o_ref[...] = (h + s.astype(jnp.float32)).astype(o_ref.dtype)


def prepare_params(params, input_dim, compute_dtype=jnp.bfloat16):
    """Pad weights/biases to lane-dense Dp, fuse (w1|ws), cast weights to bf16."""
    D = input_dim
    Dp = _round_up(D, LANE)

    def pad_w(w):
        return jnp.pad(w, ((0, Dp - D), (0, Dp - D))).astype(compute_dtype)

    def pad_b(b):
        return jnp.pad(b, ((0, 0), (0, Dp - D))).astype(jnp.float32)

    wcat = jnp.concatenate([pad_w(params["w1"]), pad_w(params["ws"])], axis=1)
    bcat = jnp.concatenate([pad_b(params["b1"]), pad_b(params["bs"])], axis=1)
    return dict(wcat=wcat, bcat=bcat,
                w2=pad_w(params["w2"]), b2=pad_b(params["b2"]),
                w3=pad_w(params["w3"]), b3=pad_b(params["b3"]))


def ff_forward(x, prepped, *, tm=1024, compute_dtype=jnp.bfloat16, out_dtype=None):
    """x: [B, D].  prepped: output of prepare_params (padded, bf16 weights).

    out_dtype=None keeps x.dtype (PyTorch semantics, f32).  Pass bf16 to halve
    the dominant per-step output DMA if the consumer tolerates it.
    """
    B, D = x.shape
    Dp = prepped["w2"].shape[0]
    out_dtype = x.dtype if out_dtype is None else out_dtype

    info = _tpu_info()
    n_cores = _num_tensorcores(info)
    vmem_budget = int(_vmem_capacity_bytes(info) * 0.85)

    weight_bytes = sum(int(prepped[k].size) * prepped[k].dtype.itemsize
                       for k in ("wcat", "w2", "w3"))
    bias_bytes = sum(int(prepped[k].size) * prepped[k].dtype.itemsize
                     for k in ("bcat", "b2", "b3"))

    def vmem_need(tm_rows, w_bufs):
        # weights (w_bufs copies) + biases + double-buffered x/out tiles
        # + intermediates (h0 f32 2*Dp wide, h f32 + bf16, s bf16).
        x_tile = tm_rows * Dp * x.dtype.itemsize            # conservative (f32 path)
        o_tile = tm_rows * Dp * jnp.dtype(out_dtype).itemsize
        inter = tm_rows * Dp * (2 * 4 + 4 + 2 + 2)
        return (w_bufs * weight_bytes + 2 * bias_bytes
                + 2 * (x_tile + o_tile) + inter)

    # ---- row-tile selection ------------------------------------------------
    Bp8 = _round_up(B, SUBLANE)
    tm_eff = min(_round_up(tm, SUBLANE), Bp8)

    # Split the batch into extra grid steps ONLY on multi-TC chips (v7x), and
    # aim for a step count that is a multiple of the core count.  On 1-TC
    # v5e/v6e a split is two serial half-size matmuls + per-step overhead.
    if n_cores > 1:
        steps = -(-Bp8 // tm_eff)
        if steps % n_cores != 0 and Bp8 >= n_cores * SUBLANE:
            target = _round_up(steps, n_cores)
            tm_eff = min(tm_eff, _round_up(-(-Bp8 // target), SUBLANE))

    # Shrink the row tile until everything fits the VMEM budget.
    while tm_eff > SUBLANE and vmem_need(tm_eff, 1) > vmem_budget:
        tm_eff = _round_up(tm_eff // 2, SUBLANE)

    Bp = _round_up(B, tm_eff)
    grid = (Bp // tm_eff,)

    # ---- input prep: skip the wrapper pad/cast pass when already aligned ----
    needs_pad = (Dp != D) or (Bp != B)
    if needs_pad:
        # Padded lanes stay exactly zero through every layer (zero weight
        # rows/cols, zero bias); padded rows are sliced away below.
        xp = jnp.pad(x.astype(compute_dtype), ((0, Bp - B), (0, Dp - D)))
    else:
        xp = x   # fed as-is; bf16 cast happens inside the kernel

    row_spec = pl.BlockSpec((tm_eff, Dp), lambda i: (i, 0))
    out_spec = pl.BlockSpec((tm_eff, Dp), lambda i: (i, 0))

    def const_spec(shape, bufs):
        # Constant index_map => operand stays VMEM-resident across the grid.
        if bufs is None:
            return pl.BlockSpec(shape, lambda i: (0, 0))
        return pl.BlockSpec(shape, lambda i: (0, 0),
                            pipeline_mode=pl.Buffered(bufs))

    io_bytes = (int(xp.size) * xp.dtype.itemsize + weight_bytes + bias_bytes
                + Bp * Dp * jnp.dtype(out_dtype).itemsize)
    cost = pl.CostEstimate(flops=2 * Bp * Dp * Dp * 4,
                           transcendentals=0,
                           bytes_accessed=io_bytes)

    def run(weight_bufs):
        w_bufs_for_need = 1 if weight_bufs == 1 else 2
        vmem_limit = int(min(vmem_budget,
                             max(32 * 1024 * 1024,
                                 vmem_need(tm_eff, w_bufs_for_need) + (2 << 20))))
        return pl.pallas_call(
            ff_kernel,
            out_shape=jax.ShapeDtypeStruct((Bp, Dp), out_dtype),
            grid_spec=pltpu.PrefetchScalarGridSpec(
                num_scalar_prefetch=0,
                grid=grid,
                in_specs=[row_spec,
                          const_spec((Dp, 2 * Dp), weight_bufs),
                          const_spec((1, 2 * Dp), weight_bufs),
                          const_spec((Dp, Dp), weight_bufs),
                          const_spec((1, Dp), weight_bufs),
                          const_spec((Dp, Dp), weight_bufs),
                          const_spec((1, Dp), weight_bufs)],
                out_specs=out_spec,
            ),
            compiler_params=pltpu.CompilerParams(
                dimension_semantics=("parallel",),
                vmem_limit_bytes=vmem_limit),
            cost_estimate=cost,
        )(xp, prepped["wcat"], prepped["bcat"],
          prepped["w2"], prepped["b2"], prepped["w3"], prepped["b3"])

    # TODO(synk): for very large D (single-buffered bf16 weights > ~40 MiB,
    # i.e. Dp >~ 2200), switch to HBM-resident weights (memory_space=pl.ANY)
    # streamed with pltpu.emit_pipeline over K (and N for wcat) with an f32
    # accumulator + pl.when init/finalize — required to fit v7x's 64 MiB VMEM.
    try:
        out = run(1)          # single-buffered constant-index weights
    except Exception:
        out = run(None)       # conservative fallback: default pipelining

    if needs_pad:
        out = out[:B, :D]
    return out


def init_params(key, input_dim):
    """Deterministic synthetic parameters (PyTorch nn.Linear-like uniform init)."""
    keys = jax.random.split(key, 8)
    bound = 1.0 / jnp.sqrt(input_dim)

    def lin(kw, kb):
        # PyTorch weight is [out, in]; we store it transposed as [in, out].
        w_pt = jax.random.uniform(kw, (input_dim, input_dim),
                                  minval=-bound, maxval=bound, dtype=jnp.float32)
        b = jax.random.uniform(kb, (1, input_dim),
                               minval=-bound, maxval=bound, dtype=jnp.float32)
        return w_pt.T, b

    w1, b1 = lin(keys[0], keys[1])
    w2, b2 = lin(keys[2], keys[3])
    w3, b3 = lin(keys[4], keys[5])
    ws, bs = lin(keys[6], keys[7])
    return dict(w1=w1, b1=b1, w2=w2, b2=b2, w3=w3, b3=b3, ws=ws, bs=bs)


def ff_reference(x, p, compute_dtype=jnp.float32, shortcut_dtype=None):
    """Pure-JAX reference; compute_dtype controls matmul-input precision.

    shortcut_dtype (optional) models the kernel holding the shortcut branch in
    bf16 before the final add.
    """
    cd = compute_dtype

    def lin(a, w, b):
        return jnp.dot(a.astype(cd), w.astype(cd),
                       preferred_element_type=jnp.float32) + b

    h = jnp.maximum(lin(x, p["w1"], p["b1"]), 0.0)
    h = jnp.maximum(lin(h, p["w2"], p["b2"]), 0.0)
    h = jnp.maximum(lin(h, p["w3"], p["b3"]), 0.0)
    s = lin(x, p["ws"], p["bs"])
    if shortcut_dtype is not None:
        s = s.astype(shortcut_dtype).astype(jnp.float32)
    return h + s


if __name__ == "__main__":
    B, D = 64, 32   # small shapes: batch=64, input_dim=32
    key = jax.random.PRNGKey(0)
    kx, kp = jax.random.split(key)

    x = jax.random.normal(kx, (B, D), dtype=jnp.float32)
    params = init_params(kp, D)
    prepped = prepare_params(params, D)

    out = ff_forward(x, prepped)
    out = jax.block_until_ready(out)
    assert out.shape == (B, D)

    # Matched-precision reference (bf16 matmul inputs, f32 acc, bf16 shortcut).
    ref_bf16 = ff_reference(x, params, compute_dtype=jnp.bfloat16,
                            shortcut_dtype=jnp.bfloat16)
    assert jnp.allclose(out, ref_bf16, atol=2e-3, rtol=2e-3), \
        "mismatch vs matched-precision reference"

    # Loose sanity check vs pure-f32 PyTorch semantics.
    ref_f32 = ff_reference(x, params, compute_dtype=jnp.float32)
    assert jnp.allclose(out, ref_f32, atol=1e-1, rtol=1e-1), \
        "mismatch vs f32 reference"

    print("KERNEL_OK")
</pallas_src>

<mosaic_0001>
module attributes {stable_mosaic.version = 11 : i64} {
  func.func @ff_kernel(%arg0: i32, %arg1: memref<64x128xbf16, #tpu.memory_space<vmem>>, %arg2: memref<128x256xbf16, #tpu.memory_space<vmem>>, %arg3: memref<1x256xf32, #tpu.memory_space<vmem>>, %arg4: memref<128x128xbf16, #tpu.memory_space<vmem>>, %arg5: memref<1x128xf32, #tpu.memory_space<vmem>>, %arg6: memref<128x128xbf16, #tpu.memory_space<vmem>>, %arg7: memref<1x128xf32, #tpu.memory_space<vmem>>, %arg8: memref<64x128xf32, #tpu.memory_space<vmem>>) attributes {dimension_semantics = [#tpu.dimension_semantics<parallel>], iteration_bounds = array<i64: 1>, scalar_prefetch = 0 : i64, scratch_operands = 0 : i64, tpu.core_type = #tpu.core_type<tc>, window_params = [{transform_indices = @transform_0, window_bounds = array<i64: 64, 128>}, {pipeline_mode = #tpu.pipeline_mode<synchronous>, transform_indices = @transform_1, window_bounds = array<i64: 128, 256>}, {pipeline_mode = #tpu.pipeline_mode<synchronous>, transform_indices = @transform_2, window_bounds = array<i64: 1, 256>}, {pipeline_mode = #tpu.pipeline_mode<synchronous>, transform_indices = @transform_3, window_bounds = array<i64: 128, 128>}, {pipeline_mode = #tpu.pipeline_mode<synchronous>, transform_indices = @transform_4, window_bounds = array<i64: 1, 128>}, {pipeline_mode = #tpu.pipeline_mode<synchronous>, transform_indices = @transform_5, window_bounds = array<i64: 128, 128>}, {pipeline_mode = #tpu.pipeline_mode<synchronous>, transform_indices = @transform_6, window_bounds = array<i64: 1, 128>}, {transform_indices = @transform_7, window_bounds = array<i64: 64, 128>}]} {
    %c0 = arith.constant 0 : index
    %c0_0 = arith.constant 0 : index
    %0 = vector.load %arg1[%c0, %c0_0] : memref<64x128xbf16, #tpu.memory_space<vmem>>, vector<64x128xbf16>
    %c0_1 = arith.constant 0 : index
    %c0_2 = arith.constant 0 : index
    %1 = vector.load %arg2[%c0_1, %c0_2] : memref<128x256xbf16, #tpu.memory_space<vmem>>, vector<128x256xbf16>
    %cst = arith.constant dense<0.000000e+00> : vector<64x256xf32>
    %2 = tpu.matmul %0, %1, %cst {dimension_numbers = #tpu.dot_dimension_numbers<[1], [0], [0], [1], [0, 0, 1, 1], [], []>} : vector<64x128xbf16>, vector<128x256xbf16>, vector<64x256xf32> -> vector<64x256xf32>
    %c0_3 = arith.constant 0 : index
    %c0_4 = arith.constant 0 : index
    %3 = vector.load %arg3[%c0_3, %c0_4] : memref<1x256xf32, #tpu.memory_space<vmem>>, vector<1x256xf32>
    %4 = vector.broadcast %3 : vector<1x256xf32> to vector<64x256xf32>
    %5 = arith.addf %2, %4 : vector<64x256xf32>
    %6 = vector.extract_strided_slice %5 {offsets = [0, 0], sizes = [64, 128], strides = [1, 1]} : vector<64x256xf32> to vector<64x128xf32>
    %cst_5 = arith.constant 0.000000e+00 : f32
    %7 = vector.broadcast %cst_5 : f32 to vector<64x128xf32>
    %8 = arith.maximumf %6, %7 : vector<64x128xf32>
    %9 = arith.truncf %8 : vector<64x128xf32> to vector<64x128xbf16>
    %10 = vector.extract_strided_slice %5 {offsets = [0, 128], sizes = [64, 128], strides = [1, 1]} : vector<64x256xf32> to vector<64x128xf32>
    %11 = arith.truncf %10 : vector<64x128xf32> to vector<64x128xbf16>
    %c0_6 = arith.constant 0 : index
    %c0_7 = arith.constant 0 : index
    %12 = vector.load %arg4[%c0_6, %c0_7] : memref<128x128xbf16, #tpu.memory_space<vmem>>, vector<128x128xbf16>
    %cst_8 = arith.constant dense<0.000000e+00> : vector<64x128xf32>
    %13 = tpu.matmul %9, %12, %cst_8 {dimension_numbers = #tpu.dot_dimension_numbers<[1], [0], [0], [1], [0, 0, 1, 1], [], []>} : vector<64x128xbf16>, vector<128x128xbf16>, vector<64x128xf32> -> vector<64x128xf32>
    %c0_9 = arith.constant 0 : index
    %c0_10 = arith.constant 0 : index
    %14 = vector.load %arg5[%c0_9, %c0_10] : memref<1x128xf32, #tpu.memory_space<vmem>>, vector<1x128xf32>
    %15 = vector.broadcast %14 : vector<1x128xf32> to vector<64x128xf32>
    %16 = arith.addf %13, %15 : vector<64x128xf32>
    %cst_11 = arith.constant 0.000000e+00 : f32
    %17 = vector.broadcast %cst_11 : f32 to vector<64x128xf32>
    %18 = arith.maximumf %16, %17 : vector<64x128xf32>
    %19 = arith.truncf %18 : vector<64x128xf32> to vector<64x128xbf16>
    %c0_12 = arith.constant 0 : index
    %c0_13 = arith.constant 0 : index
    %20 = vector.load %arg6[%c0_12, %c0_13] : memref<128x128xbf16, #tpu.memory_space<vmem>>, vector<128x128xbf16>
    %cst_14 = arith.constant dense<0.000000e+00> : vector<64x128xf32>
    %21 = tpu.matmul %19, %20, %cst_14 {dimension_numbers = #tpu.dot_dimension_numbers<[1], [0], [0], [1], [0, 0, 1, 1], [], []>} : vector<64x128xbf16>, vector<128x128xbf16>, vector<64x128xf32> -> vector<64x128xf32>
    %c0_15 = arith.constant 0 : index
    %c0_16 = arith.constant 0 : index
    %22 = vector.load %arg7[%c0_15, %c0_16] : memref<1x128xf32, #tpu.memory_space<vmem>>, vector<1x128xf32>
    %23 = vector.broadcast %22 : vector<1x128xf32> to vector<64x128xf32>
    %24 = arith.addf %21, %23 : vector<64x128xf32>
    %cst_17 = arith.constant 0.000000e+00 : f32
    %25 = vector.broadcast %cst_17 : f32 to vector<64x128xf32>
    %26 = arith.maximumf %24, %25 : vector<64x128xf32>
    %27 = arith.extf %11 : vector<64x128xbf16> to vector<64x128xf32>
    %28 = arith.addf %26, %27 : vector<64x128xf32>
    %c0_18 = arith.constant 0 : index
    %c0_19 = arith.constant 0 : index
    %29 = vector.load %arg8[%c0_18, %c0_19] : memref<64x128xf32, #tpu.memory_space<vmem>>, vector<64x128xf32>
    tpu.vector_store %arg8[%c0_18, %c0_19], %28 {strides = array<i32>} : memref<64x128xf32, #tpu.memory_space<vmem>>, vector<64x128xf32>,
    return
  }
  func.func @transform_0(%arg0: i32) -> (i32, i32) {
    %c0_i32 = arith.constant 0 : i32
    %c0_i32_0 = arith.constant 0 : i32
    return %arg0, %c0_i32 : i32, i32
  }
  func.func @transform_1(%arg0: i32) -> (i32, i32) {
    %c0_i32 = arith.constant 0 : i32
    %c0_i32_0 = arith.constant 0 : i32
    %c0_i32_1 = arith.constant 0 : i32
    return %c0_i32, %c0_i32_0 : i32, i32
  }
  func.func @transform_2(%arg0: i32) -> (i32, i32) {
    %c0_i32 = arith.constant 0 : i32
    %c0_i32_0 = arith.constant 0 : i32
    %c0_i32_1 = arith.constant 0 : i32
    return %c0_i32, %c0_i32_0 : i32, i32
  }
  func.func @transform_3(%arg0: i32) -> (i32, i32) {
    %c0_i32 = arith.constant 0 : i32
    %c0_i32_0 = arith.constant 0 : i32
    %c0_i32_1 = arith.constant 0 : i32
    return %c0_i32, %c0_i32_0 : i32, i32
  }
  func.func @transform_4(%arg0: i32) -> (i32, i32) {
    %c0_i32 = arith.constant 0 : i32
    %c0_i32_0 = arith.constant 0 : i32
    %c0_i32_1 = arith.constant 0 : i32
    return %c0_i32, %c0_i32_0 : i32, i32
  }
  func.func @transform_5(%arg0: i32) -> (i32, i32) {
    %c0_i32 = arith.constant 0 : i32
    %c0_i32_0 = arith.constant 0 : i32
    %c0_i32_1 = arith.constant 0 : i32
    return %c0_i32, %c0_i32_0 : i32, i32
  }
  func.func @transform_6(%arg0: i32) -> (i32, i32) {
    %c0_i32 = arith.constant 0 : i32
    %c0_i32_0 = arith.constant 0 : i32
    %c0_i32_1 = arith.constant 0 : i32
    return %c0_i32, %c0_i32_0 : i32, i32
  }
  func.func @transform_7(%arg0: i32) -> (i32, i32) {
    %c0_i32 = arith.constant 0 : i32
    %c0_i32_0 = arith.constant 0 : i32
    return %arg0, %c0_i32 : i32, i32
  }
}

module attributes {stable_mosaic.version = 11 : i64} {
  func.func @ff_kernel(%arg0: i32, %arg1: memref<64x128xbf16, #tpu.memory_space<vmem>>, %arg2: memref<128x256xbf16, #tpu.memory_space<vmem>>, %arg3: memref<1x256xf32, #tpu.memory_space<vmem>>, %arg4: memref<128x128xbf16, #tpu.memory_space<vmem>>, %arg5: memref<1x128xf32, #tpu.memory_space<vmem>>, %arg6: memref<128x128xbf16, #tpu.memory_space<vmem>>, %arg7: memref<1x128xf32, #tpu.memory_space<vmem>>, %arg8: memref<64x128xf32, #tpu.memory_space<vmem>>) attributes {dimension_semantics = [#tpu.dimension_semantics<parallel>], iteration_bounds = array<i64: 1>, scalar_prefetch = 0 : i64, scratch_operands = 0 : i64, tpu.core_type = #tpu.core_type<tc>, window_params = [{transform_indices = @transform_0, window_bounds = array<i64: 64, 128>}, {pipeline_mode = #tpu.pipeline_mode<synchronous>, transform_indices = @transform_1, window_bounds = array<i64: 128, 256>}, {pipeline_mode = #tpu.pipeline_mode<synchronous>, transform_indices = @transform_2, window_bounds = array<i64: 1, 256>}, {pipeline_mode = #tpu.pipeline_mode<synchronous>, transform_indices = @transform_3, window_bounds = array<i64: 128, 128>}, {pipeline_mode = #tpu.pipeline_mode<synchronous>, transform_indices = @transform_4, window_bounds = array<i64: 1, 128>}, {pipeline_mode = #tpu.pipeline_mode<synchronous>, transform_indices = @transform_5, window_bounds = array<i64: 128, 128>}, {pipeline_mode = #tpu.pipeline_mode<synchronous>, transform_indices = @transform_6, window_bounds = array<i64: 1, 128>}, {transform_indices = @transform_7, window_bounds = array<i64: 64, 128>}]} {
    %c0 = arith.constant 0 : index
    %c0_0 = arith.constant 0 : index
    %0 = vector.load %arg1[%c0, %c0_0] : memref<64x128xbf16, #tpu.memory_space<vmem>>, vector<64x128xbf16>
    %c0_1 = arith.constant 0 : index
    %c0_2 = arith.constant 0 : index
    %1 = vector.load %arg2[%c0_1, %c0_2] : memref<128x256xbf16, #tpu.memory_space<vmem>>, vector<128x256xbf16>
    %cst = arith.constant dense<0.000000e+00> : vector<64x256xf32>
    %2 = tpu.matmul %0, %1, %cst {dimension_numbers = #tpu.dot_dimension_numbers<[1], [0], [0], [1], [0, 0, 1, 1], [], []>} : vector<64x128xbf16>, vector<128x256xbf16>, vector<64x256xf32> -> vector<64x256xf32>
    %c0_3 = arith.constant 0 : index
    %c0_4 = arith.constant 0 : index
    %3 = vector.load %arg3[%c0_3, %c0_4] : memref<1x256xf32, #tpu.memory_space<vmem>>, vector<1x256xf32>
    %4 = vector.broadcast %3 : vector<1x256xf32> to vector<64x256xf32>
    %5 = arith.addf %2, %4 : vector<64x256xf32>
    %6 = vector.extract_strided_slice %5 {offsets = [0, 0], sizes = [64, 128], strides = [1, 1]} : vector<64x256xf32> to vector<64x128xf32>
    %cst_5 = arith.constant 0.000000e+00 : f32
    %7 = vector.broadcast %cst_5 : f32 to vector<64x128xf32>
    %8 = arith.maximumf %6, %7 : vector<64x128xf32>
    %9 = arith.truncf %8 : vector<64x128xf32> to vector<64x128xbf16>
    %10 = vector.extract_strided_slice %5 {offsets = [0, 128], sizes = [64, 128], strides = [1, 1]} : vector<64x256xf32> to vector<64x128xf32>
    %11 = arith.truncf %10 : vector<64x128xf32> to vector<64x128xbf16>
    %c0_6 = arith.constant 0 : index
    %c0_7 = arith.constant 0 : index
    %12 = vector.load %arg4[%c0_6, %c0_7] : memref<128x128xbf16, #tpu.memory_space<vmem>>, vector<128x128xbf16>
    %cst_8 = arith.constant dense<0.000000e+00> : vector<64x128xf32>
    %13 = tpu.matmul %9, %12, %cst_8 {dimension_numbers = #tpu.dot_dimension_numbers<[1], [0], [0], [1], [0, 0, 1, 1], [], []>} : vector<64x128xbf16>, vector<128x128xbf16>, vector<64x128xf32> -> vector<64x128xf32>
    %c0_9 = arith.constant 0 : index
    %c0_10 = arith.constant 0 : index
    %14 = vector.load %arg5[%c0_9, %c0_10] : memref<1x128xf32, #tpu.memory_space<vmem>>, vector<1x128xf32>
    %15 = vector.broadcast %14 : vector<1x128xf32> to vector<64x128xf32>
    %16 = arith.addf %13, %15 : vector<64x128xf32>
    %cst_11 = arith.constant 0.000000e+00 : f32
    %17 = vector.broadcast %cst_11 : f32 to vector<64x128xf32>
    %18 = arith.maximumf %16, %17 : vector<64x128xf32>
    %19 = arith.truncf %18 : vector<64x128xf32> to vector<64x128xbf16>
    %c0_12 = arith.constant 0 : index
    %c0_13 = arith.constant 0 : index
    %20 = vector.load %arg6[%c0_12, %c0_13] : memref<128x128xbf16, #tpu.memory_space<vmem>>, vector<128x128xbf16>
    %cst_14 = arith.constant dense<0.000000e+00> : vector<64x128xf32>
    %21 = tpu.matmul %19, %20, %cst_14 {dimension_numbers = #tpu.dot_dimension_numbers<[1], [0], [0], [1], [0, 0, 1, 1], [], []>} : vector<64x128xbf16>, vector<128x128xbf16>, vector<64x128xf32> -> vector<64x128xf32>
    %c0_15 = arith.constant 0 : index
    %c0_16 = arith.constant 0 : index
    %22 = vector.load %arg7[%c0_15, %c0_16] : memref<1x128xf32, #tpu.memory_space<vmem>>, vector<1x128xf32>
    %23 = vector.broadcast %22 : vector<1x128xf32> to vector<64x128xf32>
    %24 = arith.addf %21, %23 : vector<64x128xf32>
    %cst_17 = arith.constant 0.000000e+00 : f32
    %25 = vector.broadcast %cst_17 : f32 to vector<64x128xf32>
    %26 = arith.maximumf %24, %25 : vector<64x128xf32>
    %27 = arith.extf %11 : vector<64x128xbf16> to vector<64x128xf32>
    %28 = arith.addf %26, %27 : vector<64x128xf32>
    %c0_18 = arith.constant 0 : index
    %c0_19 = arith.constant 0 : index
    %29 = vector.load %arg8[%c0_18, %c0_19] : memref<64x128xf32, #tpu.memory_space<vmem>>, vector<64x128xf32>
    tpu.vector_store %arg8[%c0_18, %c0_19], %28 {strides = array<i32>} : memref<64x128xf32, #tpu.memory_space<vmem>>, vector<64x128xf32>,
    return
  }
  func.func @transform_0(%arg0: i32) -> (i32, i32) {
    %c0_i32 = arith.constant 0 : i32
    %c0_i32_0 = arith.constant 0 : i32
    return %arg0, %c0_i32 : i32, i32
  }
  func.func @transform_1(%arg0: i32) -> (i32, i32) {
    %c0_i32 = arith.constant 0 : i32
    %c0_i32_0 = arith.constant 0 : i32
    %c0_i32_1 = arith.constant 0 : i32
    return %c0_i32, %c0_i32_0 : i32, i32
  }
  func.func @transform_2(%arg0: i32) -> (i32, i32) {
    %c0_i32 = arith.constant 0 : i32
    %c0_i32_0 = arith.constant 0 : i32
    %c0_i32_1 = arith.constant 0 : i32
    return %c0_i32, %c0_i32_0 : i32, i32
  }
  func.func @transform_3(%arg0: i32) -> (i32, i32) {
    %c0_i32 = arith.constant 0 : i32
    %c0_i32_0 = arith.constant 0 : i32
    %c0_i32_1 = arith.constant 0 : i32
    return %c0_i32, %c0_i32_0 : i32, i32
  }
  func.func @transform_4(%arg0: i32) -> (i32, i32) {
    %c0_i32 = arith.constant 0 : i32
    %c0_i32_0 = arith.constant 0 : i32
    %c0_i32_1 = arith.constant 0 : i32
    return %c0_i32, %c0_i32_0 : i32, i32
  }
  func.func @transform_5(%arg0: i32) -> (i32, i32) {
    %c0_i32 = arith.constant 0 : i32
    %c0_i32_0 = arith.constant 0 : i32
    %c0_i32_1 = arith.constant 0 : i32
    return %c0_i32, %c0_i32_0 : i32, i32
  }
  func.func @transform_6(%arg0: i32) -> (i32, i32) {
    %c0_i32 = arith.constant 0 : i32
    %c0_i32_0 = arith.constant 0 : i32
    %c0_i32_1 = arith.constant 0 : i32
    return %c0_i32, %c0_i32_0 : i32, i32
  }
  func.func @transform_7(%arg0: i32) -> (i32, i32) {
    %c0_i32 = arith.constant 0 : i32
    %c0_i32_0 = arith.constant 0 : i32
    return %arg0, %c0_i32 : i32, i32
  }
}

</mosaic_0001>

<bundles_post_ra>
// kernel: tpu_custom_call.1
= control target key start
LH: loop header
LB: loop body
LE: loop exit
PB: predicated region body
PF: predicated region fallthrough
CT: control target
= control target key end

     0   :  { %12 = vsyncpa [#allocation3], 0  ;;  %s1058_s0 = inlined_call_operand.hbm [shape: bf16[64,128], index: 0, kind: input, shape index: {}]   ;;  %s1059_s1 = inlined_call_operand.hbm [shape: bf16[128,256], index: 1, kind: input, shape index: {}]   ;;  %s1060_s2 = inlined_call_operand.vmem [shape: f32[1,256], index: 2, kind: input, shape index: {}]   ;;  %s1061_s3 = inlined_call_operand.hbm [shape: bf16[128,128], index: 3, kind: input, shape index: {}]   ;;  %s1062_s4 = inlined_call_operand.vmem [shape: f32[1,128], index: 4, kind: input, shape index: {}]   ;;  %s1063_s5 = inlined_call_operand.hbm [shape: bf16[128,128], index: 5, kind: input, shape index: {}]   ;;  %s1064_s6 = inlined_call_operand.vmem [shape: f32[1,128], index: 6, kind: input, shape index: {}]   ;;  %s1065_s7 = inlined_call_operand.hbm [shape: f32[64,128], index: 7, kind: output, shape index: {}]  }
   0x1   :  { %13 = vsyncpa [#allocation6], 0 }
   0x2   :  { %14 = vsyncpa [#allocation9], 0 }
   0x3   :  { %15 = vsyncpa [#allocation4], 0  ;;  %s935_s24 = smov [#allocation5]  }
   0x4   :  { %s33_s25 = sshll.u32 %s935_s24, 4  ;;  %s34_s25 = int_to_ptr.vmem [resolvable:$true] %s33_s25 }
   0x5   :  { %s835_s26 = scalar_lea.vmem %s34_s25, 2048  ;;  %p840_p1 = scmp.lt.s32.totalorder %s34_s25, %s34_s25 }
   0x6   :  { %p836_p0 = scmp.ne.s32.totalorder %s34_s25, %s835_s26  ;;  %p841_p2 = scmp.lt.s32.totalorder %s835_s26, %s835_s26 }
   0x8   :  { %p842_p3 = por %p841_p2, %p840_p1 }
   0xa   :  { %p843_p4 = pnand %p842_p3, %p836_p0 }
   0xc   :  { %846 = shalt.err (!%p843_p4)
}
   0xd   :  { %s936_s27 = smov 128   ;;  %s937_s28 = smov 8  }
   0xe   :  { %39 = dma.hbm_to_vmem [thread:$0]  %s1059_s1, 2048, %s34_s25, [#allocation6], %s936_s27, %s936_s27, %s937_s28  }
   0xf   :  { %s938_s8 = smov [#allocation2]  }
  0x10   :  { %s21_s9 = sshll.u32 %s938_s8, 4  ;;  %s22_s9 = int_to_ptr.vmem [resolvable:$true] %s21_s9 }
  0x11   :  { %s855_s10 = scalar_lea.vmem %s22_s9, 512  ;;  %p860_p6 = scmp.lt.s32.totalorder %s22_s9, %s22_s9 }
  0x12   :  { %p856_p5 = scmp.ne.s32.totalorder %s22_s9, %s855_s10  ;;  %p861_p7 = scmp.lt.s32.totalorder %s855_s10, %s855_s10 }
  0x14   :  { %p862_p8 = por %p861_p7, %p860_p6 }
  0x16   :  { %p863_p9 = pnand %p862_p8, %p856_p5 }
  0x18   :  { %866 = shalt.err (!%p863_p9)
}
  0x19   :  { %s939_s11 = smov 64   ;;  %s940_s12 = smov 4  }
  0x1a   :  { %27 = dma.hbm_to_vmem [thread:$0]  %s1058_s0, 512, %s22_s9, [#allocation3], %s939_s11, %s939_s11, %s940_s12  }
  0x1b   :  { %s941_s15 = smov [#allocation7]   ;;  %s942_s17 = smov [#allocation8]  }
  0x1c   :  { %s47_s16 = sshll.u32 %s941_s15, 4  ;;  %s61_s1 = sshll.u32 %s942_s17, 4  ;;  %s48_s16 = int_to_ptr.vmem [resolvable:$true] %s47_s16  ;;  %s62_s1 = int_to_ptr.vmem [resolvable:$true] %s61_s1 }
  0x1d   :  { %s875_s18 = scalar_lea.vmem %s48_s16, 1024  ;;  %p880_p11 = scmp.lt.s32.totalorder %s48_s16, %s48_s16 }
  0x1e   :  { %p876_p10 = scmp.ne.s32.totalorder %s48_s16, %s875_s18  ;;  %p881_p12 = scmp.lt.s32.totalorder %s875_s18, %s875_s18 }
  0x20   :  { %p882_p13 = por %p881_p12, %p880_p11 }
  0x22   :  { %p883_p0 = pnand %p882_p13, %p876_p10 }
  0x24   :  { %886 = shalt.err (!%p883_p0)
}
  0x25   :  { %53 = dma.hbm_to_vmem [thread:$0]  %s1061_s3, 1024, %s48_s16, [#allocation6], %s939_s11, %s939_s11, %s940_s12  }
  0x26   :  { %s895_s21 = scalar_lea.vmem %s62_s1, 1024  ;;  %p900_p2 = scmp.lt.s32.totalorder %s62_s1, %s62_s1 }
  0x27   :  { %p896_p1 = scmp.ne.s32.totalorder %s62_s1, %s895_s21  ;;  %p901_p3 = scmp.lt.s32.totalorder %s895_s21, %s895_s21 }
  0x29   :  { %p902_p4 = por %p901_p3, %p900_p2 }
  0x2b   :  { %p903_p5 = pnand %p902_p4, %p896_p1 }
  0x2d   :  { %906 = shalt.err (!%p903_p5)
}
  0x2e   :  { %67 = dma.hbm_to_vmem [thread:$0]  %s1063_s5, 1024, %s62_s1, [#allocation9], %s939_s11, %s939_s11, %s940_s12  }
  0x2f   :  { %927 = dma.done.wait [#allocation3], 512  }
  0x30   :  { %928 = vsyncadd [#allocation3], 4294966784 }
  0x31   :  { %929 = dma.done.wait [#allocation6], 3072  }
  0x32   :  { %930 = vsyncadd [#allocation6], 4294964224 }
  0x33   :  { %931 = dma.done.wait [#allocation9], 1024  }
  0x34   :  { %932 = vsyncadd [#allocation9], 4294966272  ;;  %v943_v0 = vmov 0   ;;  %v783_v1 = vld [vmem:[#allocation5 + $0x74] ss:$8 sps:$4 sm:$0xff]   ;;  %v813_v16 = vld [vmem:[#allocation7 + $0x28] sm:$0xff]   ;;  %v109_v34 = vlaneseq }
  0x35   :  { %255 = vmatprep.mubr.bf16.mxu0 %v943_v0  ;;  %v785_v2 = vld [vmem:[#allocation5 + $0x70] ss:$8 sps:$4 sm:$0xff]   ;;  %223 = vmatprep.subr.bf16.mxu0 %v783_v1  ;;  %v786_v3 = vld [vmem:[#allocation5 + $0x64] ss:$8 sps:$4 sm:$0xff]   ;;  %v788_v4 = vld [vmem:[#allocation5 + $0x60] ss:$8 sps:$4 sm:$0xff]  }
  0x36   :  { %224 = vmatpush1.bf16.msra.mxu0 %v785_v2  ;;  %v789_v5 = vld [vmem:[#allocation5 + $0x54] ss:$8 sps:$4 sm:$0xff]   ;;  %v791_v6 = vld [vmem:[#allocation5 + $0x50] ss:$8 sps:$4 sm:$0xff]   ;;  %v792_v7 = vld [vmem:[#allocation5 + $0x44] ss:$8 sps:$4 sm:$0xff]  }
  0x37   :  { %225 = vmatprep.subr.bf16.mxu0 %v786_v3  ;;  %v794_v8 = vld [vmem:[#allocation5 + $0x40] ss:$8 sps:$4 sm:$0xff]   ;;  %v795_v9 = vld [vmem:[#allocation5 + $0x34] ss:$8 sps:$4 sm:$0xff]   ;;  %v797_v10 = vld [vmem:[#allocation5 + $0x30] ss:$8 sps:$4 sm:$0xff]  }
  0x38   :  { %v798_v11 = vld [vmem:[#allocation5 + $0x24] ss:$8 sps:$4 sm:$0xff]   ;;  %v811_v12 = vld [vmem:[#allocation7 + $0x38] sm:$0xff]   ;;  %v812_v13 = vld [vmem:[#allocation7 + $0x30] sm:$0xff]   ;;  %v110_v35 = vshrl.u32 %v109_v34, 7 }
  0x39   :  { %v800_v14 = vld [vmem:[#allocation5 + $0x20] ss:$8 sps:$4 sm:$0xff]   ;;  %709 = vmatprep.subr.bf16.mxu1 %v811_v12  ;;  %v801_v15 = vld [vmem:[#allocation5 + $0x14] ss:$8 sps:$4 sm:$0xff]   ;;  %v803_v17 = vld [vmem:[#allocation5 + $0x10] ss:$8 sps:$4 sm:$0xff]  }
  0x3a   :  { %226 = vmatpush1.bf16.msra.mxu0 %v788_v4  ;;  %710 = vmatpush3.bf16.msra.mxu1 %v811_v12  ;;  %v814_v18 = vld [vmem:[#allocation7 + $0x20] sm:$0xff]   ;;  %v808_v22 = vld [vmem:[#allocation2 + $0x8] sm:$0xff]   ;;  %v809_v23 = vld [vmem:[#allocation2 + $0x10] sm:$0xff]   ;;  %v111_v36 = vsub.s32 0, %v110_v35  ;;  %v115_v39 = vsub.s32 1, %v110_v35 }
  0x3b   :  { %227 = vmatprep.subr.bf16.mxu0 %v789_v5  ;;  %711 = vmatprep.subr.bf16.mxu1 %v812_v13  ;;  %v804_v19 = vld [vmem:[#allocation5 + $0x4] ss:$8 sps:$4 sm:$0xff]   ;;  %v806_v20 = vld [vmem:[#allocation5] ss:$8 sps:$4 sm:$0xff]   ;;  %v810_v24 = vld [vmem:[#allocation2 + $0x18] sm:$0xff]  }
  0x3c   :  { %v807_v21 = vld [vmem:[#allocation2] sm:$0xff]   ;;  %v815_v25 = vld [vmem:[#allocation7 + $0x18] sm:$0xff]   ;;  %v816_v26 = vld [vmem:[#allocation7 + $0x10] sm:$0xff]  }
  0x3d   :  { %v817_v27 = vld [vmem:[#allocation7 + $0x8] sm:$0xff]   ;;  %v818_v28 = vld [vmem:[#allocation7] sm:$0xff]   ;;  %v819_v29 = vld [vmem:[#allocation8 + $0x38] sm:$0xff]  }
  0x3e   :  { %228 = vmatpush1.bf16.msra.mxu0 %v791_v6  ;;  %712 = vmatpush3.bf16.msra.mxu1 %v812_v13  ;;  %v820_v30 = vld [vmem:[#allocation8 + $0x30] sm:$0xff]   ;;  %v1000_v31 = vld [vmem:[#allocation8 + $0x28] sm:$0xff]   ;;  %v1003_v32 = vld [vmem:[#allocation8 + $0x20] sm:$0xff]  }
  0x3f   :  { %229 = vmatprep.subr.bf16.mxu0 %v792_v7  ;;  %713 = vmatprep.subr.bf16.mxu1 %v813_v16  ;;  %v1007_v33 = vld [vmem:[#allocation8 + $0x18] sm:$0xff]   ;;  %v107_v37 = vld [vmem:[%s1060_s2] sm:$0x3] }
  0x40   :  { %v112_v38 = vrot.slane %v107_v37, %v111_v36  ;;  %v1015_v43 = vrot.slane %v107_v37, %v115_v39 }
  0x42   :  { %230 = vmatpush1.bf16.msra.mxu0 %v794_v8  ;;  %714 = vmatpush3.bf16.msra.mxu1 %v813_v16 }
  0x43   :  { %231 = vmatprep.subr.bf16.mxu0 %v795_v9  ;;  %715 = vmatprep.subr.bf16.mxu1 %v814_v18 }
  0x46   :  { %232 = vmatpush1.bf16.msra.mxu0 %v797_v10  ;;  %716 = vmatpush3.bf16.msra.mxu1 %v814_v18 }
  0x47   :  { %233 = vmatprep.subr.bf16.mxu0 %v798_v11  ;;  %717 = vmatprep.subr.bf16.mxu1 %v815_v25 }
  0x4a   :  { %234 = vmatpush1.bf16.msra.mxu0 %v800_v14  ;;  %718 = vmatpush3.bf16.msra.mxu1 %v815_v25 }
  0x4b   :  { %235 = vmatprep.subr.bf16.mxu0 %v801_v15  ;;  %719 = vmatprep.subr.bf16.mxu1 %v816_v26 }
  0x4e   :  { %236 = vmatpush1.bf16.msra.mxu0 %v803_v17  ;;  %720 = vmatpush3.bf16.msra.mxu1 %v816_v26  ;;  %v667_v26 = vld [vmem:[%s1062_s4] ss:$0 sm:$0xff] }
  0x4f   :  { %237 = vmatprep.subr.bf16.mxu0 %v804_v19  ;;  %721 = vmatprep.subr.bf16.mxu1 %v817_v27 }
  0x52   :  { %238 = vmatpush1.bf16.msra.mxu0 %v806_v20  ;;  %722 = vmatpush3.bf16.msra.mxu1 %v817_v27 }
  0x53   :  { %723 = vmatprep.subr.bf16.mxu1 %v818_v28  ;;  %733 = vmatprep.subr.bf16.mxu0 %v819_v29 }
  0x55   :  { %256 = vmatmul.mubr.bf16.vlgmr.msra.gmra.mxu0 %v807_v21  ;;  %v824_v21 = vld [vmem:[#allocation8 + $0x10] sm:$0xff]  }
  0x56   :  { %265 = vmatprep.mubr.bf16.mxu0 %v943_v0  ;;  %724 = vmatpush3.bf16.msra.mxu1 %v818_v28 }
  0x57   :  { %757 = vmatprep.subr.bf16.mxu1 %v819_v29  ;;  %734 = vmatpush3.bf16.msra.mxu0 %v819_v29 }
  0x58   :  { %735 = vmatprep.subr.bf16.mxu0 %v820_v30 }
  0x5b   :  { %736 = vmatpush3.bf16.msra.mxu0 %v820_v30 }
  0x5c   :  { %737 = vmatprep.subr.bf16.mxu0 %v1000_v31 }
  0x5d   :  { %266 = vmatmul.mubr.bf16.gmra.mxu0 %v808_v22  ;;  %v825_v22 = vld [vmem:[#allocation8 + $0x8] sm:$0xff]  }
  0x5e   :  { %275 = vmatprep.mubr.bf16.mxu0 %v943_v0 }
  0x5f   :  { %738 = vmatpush3.bf16.msra.mxu0 %v1000_v31 }
  0x60   :  { %739 = vmatprep.subr.bf16.mxu0 %v1003_v32 }
  0x63   :  { %740 = vmatpush3.bf16.msra.mxu0 %v1003_v32 }
  0x64   :  { %741 = vmatprep.subr.bf16.mxu0 %v1007_v33 }
  0x65   :  { %276 = vmatmul.mubr.bf16.gmra.mxu0 %v809_v23  ;;  %v826_v23 = vld [vmem:[#allocation8] sm:$0xff]  }
  0x66   :  { %285 = vmatprep.mubr.bf16.mxu0 %v943_v0 }
  0x67   :  { %742 = vmatpush3.bf16.msra.mxu0 %v1007_v33 }
  0x68   :  { %743 = vmatprep.subr.bf16.mxu0 %v824_v21 }
  0x6b   :  { %744 = vmatpush3.bf16.msra.mxu0 %v824_v21 }
  0x6c   :  { %745 = vmatprep.subr.bf16.mxu0 %v825_v22 }
  0x6d   :  { %286 = vmatmul.mubr.bf16.gmra.mxu0 %v810_v24 }
  0x6f   :  { %746 = vmatpush3.bf16.msra.mxu0 %v825_v22 }
  0x70   :  { %747 = vmatprep.subr.bf16.mxu0 %v826_v23 }
  0x73   :  { %748 = vmatpush3.bf16.msra.mxu0 %v826_v23 }
 0x115   :  { %v257_v40 = vpop.f32.mrf.mxu0 }
 0x116   :  { %v258_v42 = vadd.f32 %v257_v40, %v112_v38 }
 0x117   :  { %v259_v41 = vpop.f32.mrf.mxu0 }
 0x118   :  { %v296_v47 = vmax.f32 %v258_v42, 0.0  ;;  %v260_v48 = vadd.f32 %v259_v41, %v1015_v43 }
 0x119   :  { %v261_v44 = vpop.f32.mrf.mxu0 }
 0x11a   :  { %v262_v45 = vadd.f32 %v261_v44, %v112_v38 }
 0x11b   :  { %v263_v46 = vpop.f32.mrf.mxu0 }
 0x11c   :  { %v297_v49 = vmax.f32 %v262_v45, 0.0  ;;  %v264_v50 = vadd.f32 %v263_v46, %v1015_v43 }
 0x11d   :  { %v267_v51 = vpop.f32.mrf.mxu0 }
 0x11e   :  { %v1019_v52 = vpack.c.bf16 %v264_v50, %v260_v48  ;;  %v304_v53 = vpack.c.bf16 %v297_v49, %v296_v47  ;;  %v268_v55 = vadd.f32 %v267_v51, %v112_v38 }
 0x11f   :  { %v269_v54 = vpop.f32.mrf.mxu0 }
 0x120   :  { %725 = vmatprep.mubr.bf16.mxu1 %v304_v53  ;;  %v298_v59 = vmax.f32 %v268_v55, 0.0  ;;  %v270_v60 = vadd.f32 %v269_v54, %v1015_v43 }
 0x121   :  { %v271_v56 = vpop.f32.mrf.mxu0 }
 0x122   :  { %v272_v57 = vadd.f32 %v271_v56, %v112_v38  ;;  %v676_v56 = vld [vmem:[%s1064_s6] ss:$0 sm:$0xff]  ;;  %s944_s6 = smov [#allocation10]  }
 0x123   :  { %v273_v58 = vpop.f32.mrf.mxu0  ;;  %s633_s25 = sshll.u32 %s944_s6, 4  ;;  %s634_s25 = int_to_ptr.vmem [resolvable:$true] %s633_s25 }
 0x124   :  { %v299_v61 = vmax.f32 %v272_v57, 0.0  ;;  %v274_v62 = vadd.f32 %v273_v58, %v1015_v43  ;;  %s907_s26 = scalar_lea.vmem %s634_s25, 1024  ;;  %p912_p7 = scmp.lt.s32.totalorder %s634_s25, %s634_s25 }
 0x125   :  { %v277_v63 = vpop.f32.mrf.mxu0  ;;  %p908_p6 = scmp.ne.s32.totalorder %s634_s25, %s907_s26  ;;  %p913_p8 = scmp.lt.s32.totalorder %s907_s26, %s907_s26 }
 0x126   :  { %v305_v0 = vpack.c.bf16 %v299_v61, %v298_v59  ;;  %v1023_v1 = vpack.c.bf16 %v274_v62, %v270_v60  ;;  %v278_v3 = vadd.f32 %v277_v63, %v112_v38 }
 0x127   :  { %v279_v2 = vpop.f32.mrf.mxu0  ;;  %p914_p9 = por %p913_p8, %p912_p7 }
 0x128   :  { %726 = vmatmul.mubr.bf16.vlgmr.msra.gmra.mxu1 %v305_v0  ;;  %v300_v7 = vmax.f32 %v278_v3, 0.0  ;;  %v280_v8 = vadd.f32 %v279_v2, %v1015_v43  ;;  %v606_v60 = vunpack.c.l.bf16 %v1023_v1  ;;  %v604_v0 = vunpack.c.l.bf16 %v1019_v52 }
 0x129   :  { %v281_v4 = vpop.f32.mrf.mxu0  ;;  %765 = vmatpush3.bf16.msra.mxu1 %v819_v29  ;;  %p915_p10 = pnand %p914_p9, %p908_p6 }
 0x12a   :  { %v282_v5 = vadd.f32 %v281_v4, %v112_v38  ;;  %758 = vmatprep.subr.bf16.mxu1 %v820_v30 }
 0x12b   :  { %v283_v6 = vpop.f32.mrf.mxu0 }
 0x12c   :  { %v301_v9 = vmax.f32 %v282_v5, 0.0  ;;  %v284_v10 = vadd.f32 %v283_v6, %v1015_v43  ;;  %v607_v6 = vunpack.c.h.bf16 %v1023_v1 }
 0x12d   :  { %v287_v11 = vpop.f32.mrf.mxu0  ;;  %766 = vmatpush3.bf16.msra.mxu1 %v820_v30 }
 0x12e   :  { %v306_v12 = vpack.c.bf16 %v301_v9, %v300_v7  ;;  %v1027_v13 = vpack.c.bf16 %v284_v10, %v280_v8  ;;  %759 = vmatprep.subr.bf16.mxu1 %v1000_v31  ;;  %v288_v15 = vadd.f32 %v287_v11, %v112_v38  ;;  %v605_v10 = vunpack.c.h.bf16 %v1019_v52 }
 0x12f   :  { %v1030_v14 = vpop.f32.mrf.mxu0 }
 0x130   :  { %729 = vmatprep.mubr.bf16.mxu1 %v306_v12  ;;  %v302_v18 = vmax.f32 %v288_v15, 0.0  ;;  %v608_v52 = vunpack.c.l.bf16 %v1027_v13 }
 0x131   :  { %v291_v16 = vpop.f32.mrf.mxu0  ;;  %767 = vmatpush3.bf16.msra.mxu1 %v1000_v31 }
 0x132   :  { %v292_v17 = vadd.f32 %v291_v16, %v112_v38  ;;  %760 = vmatprep.subr.bf16.mxu1 %v1003_v32 }
 0x133   :  { %v293_v55 = vpop.f32.mrf.mxu0 }
 0x134   :  { %v303_v19 = vmax.f32 %v292_v17, 0.0  ;;  %v294_v15 = vadd.f32 %v293_v55, %v1015_v43  ;;  %v290_v17 = vadd.f32 %v1030_v14, %v1015_v43  ;;  %v609_v14 = vunpack.c.h.bf16 %v1027_v13 }
 0x135   :  { %768 = vmatpush3.bf16.msra.mxu1 %v1003_v32 }
 0x136   :  { %v307_v20 = vpack.c.bf16 %v303_v19, %v302_v18  ;;  %761 = vmatprep.subr.bf16.mxu1 %v1007_v33  ;;  %v311_v18 = vpack.c.bf16 %v294_v15, %v290_v17 }
 0x138   :  { %730 = vmatmul.mubr.bf16.gmra.mxu1 %v307_v20 }
 0x139   :  { %769 = vmatpush3.bf16.msra.mxu1 %v1007_v33 }
 0x13a   :  { %762 = vmatprep.subr.bf16.mxu1 %v824_v21 }
 0x13d   :  { %770 = vmatpush3.bf16.msra.mxu1 %v824_v21  ;;  %v610_v21 = vunpack.c.l.bf16 %v311_v18 }
 0x13e   :  { %763 = vmatprep.subr.bf16.mxu1 %v825_v22 }
 0x141   :  { %771 = vmatpush3.bf16.msra.mxu1 %v825_v22 }
 0x142   :  { %764 = vmatprep.subr.bf16.mxu1 %v826_v23 }
 0x145   :  { %772 = vmatpush3.bf16.msra.mxu1 %v826_v23 }
 0x1e8   :  { %v727_v24 = vpop.f32.mrf.mxu1 }
 0x1e9   :  { %v426_v30 = vadd.f32 %v727_v24, %v667_v26 }
 0x1ea   :  { %v417_v25 = vpop.f32.mrf.mxu1 }
 0x1eb   :  { %v418_v28 = vadd.f32 %v667_v26, %v417_v25  ;;  %v450_v36 = vmax.f32 %v426_v30, 0.0 }
 0x1ec   :  { %v728_v27 = vpop.f32.mrf.mxu1 }
 0x1ed   :  { %v429_v29 = vadd.f32 %v728_v27, %v667_v26  ;;  %v448_v34 = vmax.f32 %v418_v28, 0.0 }
 0x1ee   :  { %v420_v31 = vpop.f32.mrf.mxu1 }
 0x1ef   :  { %v421_v32 = vadd.f32 %v667_v26, %v420_v31  ;;  %v451_v33 = vmax.f32 %v429_v29, 0.0  ;;  %v611_v29 = vunpack.c.h.bf16 %v311_v18 }
 0x1f1   :  { %v449_v35 = vmax.f32 %v421_v32, 0.0  ;;  %v457_v38 = vpack.c.bf16 %v451_v33, %v450_v36 }
 0x1f3   :  { %v456_v37 = vpack.c.bf16 %v449_v35, %v448_v34 }
 0x1f5   :  { %749 = vmatprep.mubr.bf16.mxu0 %v456_v37 }
 0x1f6   :  { %750 = vmatmul.mubr.bf16.vlgmr.msra.gmra.mxu0 %v457_v38 }
 0x1f8   :  { %v731_v39 = vpop.f32.mrf.mxu1 }
 0x1f9   :  { %v442_v45 = vadd.f32 %v731_v39, %v667_v26 }
 0x1fa   :  { %v433_v40 = vpop.f32.mrf.mxu1 }
 0x1fb   :  { %v434_v42 = vadd.f32 %v667_v26, %v433_v40  ;;  %v454_v51 = vmax.f32 %v442_v45, 0.0 }
 0x1fc   :  { %v732_v41 = vpop.f32.mrf.mxu1 }
 0x1fd   :  { %v445_v44 = vadd.f32 %v732_v41, %v667_v26  ;;  %v452_v49 = vmax.f32 %v434_v42, 0.0 }
 0x1fe   :  { %v436_v46 = vpop.f32.mrf.mxu1 }
 0x1ff   :  { %v437_v47 = vadd.f32 %v667_v26, %v436_v46  ;;  %v455_v48 = vmax.f32 %v445_v44, 0.0 }
 0x201   :  { %v453_v50 = vmax.f32 %v437_v47, 0.0  ;;  %v459_v54 = vpack.c.bf16 %v455_v48, %v454_v51 }
 0x203   :  { %v458_v53 = vpack.c.bf16 %v453_v50, %v452_v49 }
 0x205   :  { %753 = vmatprep.mubr.bf16.mxu1 %v458_v53 }
 0x206   :  { %754 = vmatmul.mubr.bf16.vlgmr.msra.gmra.mxu1 %v459_v54 }
 0x2b6   :  { %v751_v57 = vpop.f32.mrf.mxu0 }
 0x2b7   :  { %v574_v58 = vadd.f32 %v751_v57, %v676_v56 }
 0x2b8   :  { %v565_v59 = vpop.f32.mrf.mxu0 }
 0x2b9   :  { %v598_v61 = vmax.f32 %v574_v58, 0.0  ;;  %v566_v62 = vadd.f32 %v676_v56, %v565_v59 }
 0x2ba   :  { %v752_v63 = vpop.f32.mrf.mxu0 }
 0x2bb   :  { %v614_v2 = vadd.f32 %v606_v60, %v598_v61  ;;  %v596_v3 = vmax.f32 %v566_v62, 0.0  ;;  %v577_v4 = vadd.f32 %v752_v63, %v676_v56 }
 0x2bc   :  { %v568_v5 = vpop.f32.mrf.mxu0 }
 0x2bd   :  { %622 = vst [vmem:[#allocation10 + $0x10] sm:$0xff] %v614_v2  ;;  %v612_v7 = vadd.f32 %v604_v0, %v596_v3  ;;  %v599_v8 = vmax.f32 %v577_v4, 0.0  ;;  %v569_v9 = vadd.f32 %v676_v56, %v568_v5 }
 0x2bf   :  { %620 = vst [vmem:[#allocation10] sm:$0xff] %v612_v7  ;;  %v615_v11 = vadd.f32 %v607_v6, %v599_v8  ;;  %v597_v12 = vmax.f32 %v569_v9, 0.0 }
 0x2c1   :  { %623 = vst [vmem:[#allocation10 + $0x18] sm:$0xff] %v615_v11  ;;  %v613_v16 = vadd.f32 %v605_v10, %v597_v12 }
 0x2c3   :  { %621 = vst [vmem:[#allocation10 + $0x8] sm:$0xff] %v613_v16 }
 0x2c6   :  { %v755_v19 = vpop.f32.mrf.mxu1 }
 0x2c7   :  { %v590_v1 = vadd.f32 %v755_v19, %v676_v56 }
 0x2c8   :  { %v581_v20 = vpop.f32.mrf.mxu1 }
 0x2c9   :  { %v602_v22 = vmax.f32 %v590_v1, 0.0  ;;  %v582_v23 = vadd.f32 %v676_v56, %v581_v20 }
 0x2ca   :  { %v756_v24 = vpop.f32.mrf.mxu1 }
 0x2cb   :  { %v618_v25 = vadd.f32 %v610_v21, %v602_v22  ;;  %v600_v26 = vmax.f32 %v582_v23, 0.0  ;;  %v593_v27 = vadd.f32 %v756_v24, %v676_v56 }
 0x2cc   :  { %v584_v28 = vpop.f32.mrf.mxu1 }
 0x2cd   :  { %626 = vst [vmem:[#allocation10 + $0x30] sm:$0xff] %v618_v25  ;;  %v616_v30 = vadd.f32 %v608_v52, %v600_v26  ;;  %v603_v31 = vmax.f32 %v593_v27, 0.0  ;;  %v585_v43 = vadd.f32 %v676_v56, %v584_v28 }
 0x2cf   :  { %624 = vst [vmem:[#allocation10 + $0x20] sm:$0xff] %v616_v30  ;;  %v619_v32 = vadd.f32 %v611_v29, %v603_v31  ;;  %v601_v33 = vmax.f32 %v585_v43, 0.0 }
 0x2d1   :  { %627 = vst [vmem:[#allocation10 + $0x38] sm:$0xff] %v619_v32  ;;  %v617_v34 = vadd.f32 %v609_v14, %v601_v33 }
 0x2d3   :  { %625 = vst [vmem:[#allocation10 + $0x28] sm:$0xff] %v617_v34 }
 0x2d4   :  { %918 = shalt.err (!%p915_p10)
}
 0x2d5   :  { %639 = dma.vmem_to_hbm [thread:$0]  %s634_s25, 1024, %s1065_s7, [#allocation4], %s936_s27, %s936_s27, %s937_s28  }
 0x2d6   :  { %933 = dma.done.wait [#allocation4], 1024  }
 0x2d7   :  { %934 = vsyncadd [#allocation4], 4294966272 }
 0x2d8   :  { %643 = vsyncpa [#allocation3], 1 }
 0x2d9   :  { %644 = vsyncpa [#allocation6], 1 }
 0x2da   :  { %645 = vsyncpa [#allocation9], 1 }
 0x2db   :  { %646 = vsyncpa [#allocation4], 1 }

// kernel: tpu_custom_call.1
= control target key start
LH: loop header
LB: loop body
LE: loop exit
PB: predicated region body
PF: predicated region fallthrough
CT: control target
= control target key end

     0   :  { %12 = vsyncpa [#allocation3], 0  ;;  %s1058_s0 = inlined_call_operand.hbm [shape: bf16[64,128], index: 0, kind: input, shape index: {}]   ;;  %s1059_s1 = inlined_call_operand.hbm [shape: bf16[128,256], index: 1, kind: input, shape index: {}]   ;;  %s1060_s2 = inlined_call_operand.vmem [shape: f32[1,256], index: 2, kind: input, shape index: {}]   ;;  %s1061_s3 = inlined_call_operand.hbm [shape: bf16[128,128], index: 3, kind: input, shape index: {}]   ;;  %s1062_s4 = inlined_call_operand.vmem [shape: f32[1,128], index: 4, kind: input, shape index: {}]   ;;  %s1063_s5 = inlined_call_operand.hbm [shape: bf16[128,128], index: 5, kind: input, shape index: {}]   ;;  %s1064_s6 = inlined_call_operand.vmem [shape: f32[1,128], index: 6, kind: input, shape index: {}]   ;;  %s1065_s7 = inlined_call_operand.hbm [shape: f32[64,128], index: 7, kind: output, shape index: {}]  }
   0x1   :  { %13 = vsyncpa [#allocation6], 0 }
   0x2   :  { %14 = vsyncpa [#allocation9], 0 }
   0x3   :  { %15 = vsyncpa [#allocation4], 0  ;;  %s935_s24 = smov [#allocation5]  }
   0x4   :  { %s33_s25 = sshll.u32 %s935_s24, 4  ;;  %s34_s25 = int_to_ptr.vmem [resolvable:$true] %s33_s25 }
   0x5   :  { %s835_s26 = scalar_lea.vmem %s34_s25, 2048  ;;  %p840_p1 = scmp.lt.s32.totalorder %s34_s25, %s34_s25 }
   0x6   :  { %p836_p0 = scmp.ne.s32.totalorder %s34_s25, %s835_s26  ;;  %p841_p2 = scmp.lt.s32.totalorder %s835_s26, %s835_s26 }
   0x8   :  { %p842_p3 = por %p841_p2, %p840_p1 }
   0xa   :  { %p843_p4 = pnand %p842_p3, %p836_p0 }
   0xc   :  { %846 = shalt.err (!%p843_p4)
}
   0xd   :  { %s936_s27 = smov 128   ;;  %s937_s28 = smov 8  }
   0xe   :  { %39 = dma.hbm_to_vmem [thread:$0]  %s1059_s1, 2048, %s34_s25, [#allocation6], %s936_s27, %s936_s27, %s937_s28  }
   0xf   :  { %s938_s8 = smov [#allocation2]  }
  0x10   :  { %s21_s9 = sshll.u32 %s938_s8, 4  ;;  %s22_s9 = int_to_ptr.vmem [resolvable:$true] %s21_s9 }
  0x11   :  { %s855_s10 = scalar_lea.vmem %s22_s9, 512  ;;  %p860_p6 = scmp.lt.s32.totalorder %s22_s9, %s22_s9 }
  0x12   :  { %p856_p5 = scmp.ne.s32.totalorder %s22_s9, %s855_s10  ;;  %p861_p7 = scmp.lt.s32.totalorder %s855_s10, %s855_s10 }
  0x14   :  { %p862_p8 = por %p861_p7, %p860_p6 }
  0x16   :  { %p863_p9 = pnand %p862_p8, %p856_p5 }
  0x18   :  { %866 = shalt.err (!%p863_p9)
}
  0x19   :  { %s939_s11 = smov 64   ;;  %s940_s12 = smov 4  }
  0x1a   :  { %27 = dma.hbm_to_vmem [thread:$0]  %s1058_s0, 512, %s22_s9, [#allocation3], %s939_s11, %s939_s11, %s940_s12  }
  0x1b   :  { %s941_s15 = smov [#allocation7]   ;;  %s942_s17 = smov [#allocation8]  }
  0x1c   :  { %s47_s16 = sshll.u32 %s941_s15, 4  ;;  %s61_s1 = sshll.u32 %s942_s17, 4  ;;  %s48_s16 = int_to_ptr.vmem [resolvable:$true] %s47_s16  ;;  %s62_s1 = int_to_ptr.vmem [resolvable:$true] %s61_s1 }
  0x1d   :  { %s875_s18 = scalar_lea.vmem %s48_s16, 1024  ;;  %p880_p11 = scmp.lt.s32.totalorder %s48_s16, %s48_s16 }
  0x1e   :  { %p876_p10 = scmp.ne.s32.totalorder %s48_s16, %s875_s18  ;;  %p881_p12 = scmp.lt.s32.totalorder %s875_s18, %s875_s18 }
  0x20   :  { %p882_p13 = por %p881_p12, %p880_p11 }
  0x22   :  { %p883_p0 = pnand %p882_p13, %p876_p10 }
  0x24   :  { %886 = shalt.err (!%p883_p0)
}
  0x25   :  { %53 = dma.hbm_to_vmem [thread:$0]  %s1061_s3, 1024, %s48_s16, [#allocation6], %s939_s11, %s939_s11, %s940_s12  }
  0x26   :  { %s895_s21 = scalar_lea.vmem %s62_s1, 1024  ;;  %p900_p2 = scmp.lt.s32.totalorder %s62_s1, %s62_s1 }
  0x27   :  { %p896_p1 = scmp.ne.s32.totalorder %s62_s1, %s895_s21  ;;  %p901_p3 = scmp.lt.s32.totalorder %s895_s21, %s895_s21 }
  0x29   :  { %p902_p4 = por %p901_p3, %p900_p2 }
  0x2b   :  { %p903_p5 = pnand %p902_p4, %p896_p1 }
  0x2d   :  { %906 = shalt.err (!%p903_p5)
}
  0x2e   :  { %67 = dma.hbm_to_vmem [thread:$0]  %s1063_s5, 1024, %s62_s1, [#allocation9], %s939_s11, %s939_s11, %s940_s12  }
  0x2f   :  { %927 = dma.done.wait [#allocation3], 512  }
  0x30   :  { %928 = vsyncadd [#allocation3], 4294966784 }
  0x31   :  { %929 = dma.done.wait [#allocation6], 3072  }
  0x32   :  { %930 = vsyncadd [#allocation6], 4294964224 }
  0x33   :  { %931 = dma.done.wait [#allocation9], 1024  }
  0x34   :  { %932 = vsyncadd [#allocation9], 4294966272  ;;  %v943_v0 = vmov 0   ;;  %v783_v1 = vld [vmem:[#allocation5 + $0x74] ss:$8 sps:$4 sm:$0xff]   ;;  %v813_v16 = vld [vmem:[#allocation7 + $0x28] sm:$0xff]   ;;  %v109_v34 = vlaneseq }
  0x35   :  { %255 = vmatprep.mubr.bf16.mxu0 %v943_v0  ;;  %v785_v2 = vld [vmem:[#allocation5 + $0x70] ss:$8 sps:$4 sm:$0xff]   ;;  %223 = vmatprep.subr.bf16.mxu0 %v783_v1  ;;  %v786_v3 = vld [vmem:[#allocation5 + $0x64] ss:$8 sps:$4 sm:$0xff]   ;;  %v788_v4 = vld [vmem:[#allocation5 + $0x60] ss:$8 sps:$4 sm:$0xff]  }
  0x36   :  { %224 = vmatpush1.bf16.msra.mxu0 %v785_v2  ;;  %v789_v5 = vld [vmem:[#allocation5 + $0x54] ss:$8 sps:$4 sm:$0xff]   ;;  %v791_v6 = vld [vmem:[#allocation5 + $0x50] ss:$8 sps:$4 sm:$0xff]   ;;  %v792_v7 = vld [vmem:[#allocation5 + $0x44] ss:$8 sps:$4 sm:$0xff]  }
  0x37   :  { %225 = vmatprep.subr.bf16.mxu0 %v786_v3  ;;  %v794_v8 = vld [vmem:[#allocation5 + $0x40] ss:$8 sps:$4 sm:$0xff]   ;;  %v795_v9 = vld [vmem:[#allocation5 + $0x34] ss:$8 sps:$4 sm:$0xff]   ;;  %v797_v10 = vld [vmem:[#allocation5 + $0x30] ss:$8 sps:$4 sm:$0xff]  }
  0x38   :  { %v798_v11 = vld [vmem:[#allocation5 + $0x24] ss:$8 sps:$4 sm:$0xff]   ;;  %v811_v12 = vld [vmem:[#allocation7 + $0x38] sm:$0xff]   ;;  %v812_v13 = vld [vmem:[#allocation7 + $0x30] sm:$0xff]   ;;  %v110_v35 = vshrl.u32 %v109_v34, 7 }
  0x39   :  { %v800_v14 = vld [vmem:[#allocation5 + $0x20] ss:$8 sps:$4 sm:$0xff]   ;;  %709 = vmatprep.subr.bf16.mxu1 %v811_v12  ;;  %v801_v15 = vld [vmem:[#allocation5 + $0x14] ss:$8 sps:$4 sm:$0xff]   ;;  %v803_v17 = vld [vmem:[#allocation5 + $0x10] ss:$8 sps:$4 sm:$0xff]  }
  0x3a   :  { %226 = vmatpush1.bf16.msra.mxu0 %v788_v4  ;;  %710 = vmatpush3.bf16.msra.mxu1 %v811_v12  ;;  %v814_v18 = vld [vmem:[#allocation7 + $0x20] sm:$0xff]   ;;  %v808_v22 = vld [vmem:[#allocation2 + $0x8] sm:$0xff]   ;;  %v809_v23 = vld [vmem:[#allocation2 + $0x10] sm:$0xff]   ;;  %v111_v36 = vsub.s32 0, %v110_v35  ;;  %v115_v39 = vsub.s32 1, %v110_v35 }
  0x3b   :  { %227 = vmatprep.subr.bf16.mxu0 %v789_v5  ;;  %711 = vmatprep.subr.bf16.mxu1 %v812_v13  ;;  %v804_v19 = vld [vmem:[#allocation5 + $0x4] ss:$8 sps:$4 sm:$0xff]   ;;  %v806_v20 = vld [vmem:[#allocation5] ss:$8 sps:$4 sm:$0xff]   ;;  %v810_v24 = vld [vmem:[#allocation2 + $0x18] sm:$0xff]  }
  0x3c   :  { %v807_v21 = vld [vmem:[#allocation2] sm:$0xff]   ;;  %v815_v25 = vld [vmem:[#allocation7 + $0x18] sm:$0xff]   ;;  %v816_v26 = vld [vmem:[#allocation7 + $0x10] sm:$0xff]  }
  0x3d   :  { %v817_v27 = vld [vmem:[#allocation7 + $0x8] sm:$0xff]   ;;  %v818_v28 = vld [vmem:[#allocation7] sm:$0xff]   ;;  %v819_v29 = vld [vmem:[#allocation8 + $0x38] sm:$0xff]  }
  0x3e   :  { %228 = vmatpush1.bf16.msra.mxu0 %v791_v6  ;;  %712 = vmatpush3.bf16.msra.mxu1 %v812_v13  ;;  %v820_v30 = vld [vmem:[#allocation8 + $0x30] sm:$0xff]   ;;  %v1000_v31 = vld [vmem:[#allocation8 + $0x28] sm:$0xff]   ;;  %v1003_v32 = vld [vmem:[#allocation8 + $0x20] sm:$0xff]  }
  0x3f   :  { %229 = vmatprep.subr.bf16.mxu0 %v792_v7  ;;  %713 = vmatprep.subr.bf16.mxu1 %v813_v16  ;;  %v1007_v33 = vld [vmem:[#allocation8 + $0x18] sm:$0xff]   ;;  %v107_v37 = vld [vmem:[%s1060_s2] sm:$0x3] }
  0x40   :  { %v112_v38 = vrot.slane %v107_v37, %v111_v36  ;;  %v1015_v43 = vrot.slane %v107_v37, %v115_v39 }
  0x42   :  { %230 = vmatpush1.bf16.msra.mxu0 %v794_v8  ;;  %714 = vmatpush3.bf16.msra.mxu1 %v813_v16 }
  0x43   :  { %231 = vmatprep.subr.bf16.mxu0 %v795_v9  ;;  %715 = vmatprep.subr.bf16.mxu1 %v814_v18 }
  0x46   :  { %232 = vmatpush1.bf16.msra.mxu0 %v797_v10  ;;  %716 = vmatpush3.bf16.msra.mxu1 %v814_v18 }
  0x47   :  { %233 = vmatprep.subr.bf16.mxu0 %v798_v11  ;;  %717 = vmatprep.subr.bf16.mxu1 %v815_v25 }
  0x4a   :  { %234 = vmatpush1.bf16.msra.mxu0 %v800_v14  ;;  %718 = vmatpush3.bf16.msra.mxu1 %v815_v25 }
  0x4b   :  { %235 = vmatprep.subr.bf16.mxu0 %v801_v15  ;;  %719 = vmatprep.subr.bf16.mxu1 %v816_v26 }
  0x4e   :  { %236 = vmatpush1.bf16.msra.mxu0 %v803_v17  ;;  %720 = vmatpush3.bf16.msra.mxu1 %v816_v26  ;;  %v667_v26 = vld [vmem:[%s1062_s4] ss:$0 sm:$0xff] }
  0x4f   :  { %237 = vmatprep.subr.bf16.mxu0 %v804_v19  ;;  %721 = vmatprep.subr.bf16.mxu1 %v817_v27 }
  0x52   :  { %238 = vmatpush1.bf16.msra.mxu0 %v806_v20  ;;  %722 = vmatpush3.bf16.msra.mxu1 %v817_v27 }
  0x53   :  { %723 = vmatprep.subr.bf16.mxu1 %v818_v28  ;;  %733 = vmatprep.subr.bf16.mxu0 %v819_v29 }
  0x55   :  { %256 = vmatmul.mubr.bf16.vlgmr.msra.gmra.mxu0 %v807_v21  ;;  %v824_v21 = vld [vmem:[#allocation8 + $0x10] sm:$0xff]  }
  0x56   :  { %265 = vmatprep.mubr.bf16.mxu0 %v943_v0  ;;  %724 = vmatpush3.bf16.msra.mxu1 %v818_v28 }
  0x57   :  { %757 = vmatprep.subr.bf16.mxu1 %v819_v29  ;;  %734 = vmatpush3.bf16.msra.mxu0 %v819_v29 }
  0x58   :  { %735 = vmatprep.subr.bf16.mxu0 %v820_v30 }
  0x5b   :  { %736 = vmatpush3.bf16.msra.mxu0 %v820_v30 }
  0x5c   :  { %737 = vmatprep.subr.bf16.mxu0 %v1000_v31 }
  0x5d   :  { %266 = vmatmul.mubr.bf16.gmra.mxu0 %v808_v22  ;;  %v825_v22 = vld [vmem:[#allocation8 + $0x8] sm:$0xff]  }
  0x5e   :  { %275 = vmatprep.mubr.bf16.mxu0 %v943_v0 }
  0x5f   :  { %738 = vmatpush3.bf16.msra.mxu0 %v1000_v31 }
  0x60   :  { %739 = vmatprep.subr.bf16.mxu0 %v1003_v32 }
  0x63   :  { %740 = vmatpush3.bf16.msra.mxu0 %v1003_v32 }
  0x64   :  { %741 = vmatprep.subr.bf16.mxu0 %v1007_v33 }
  0x65   :  { %276 = vmatmul.mubr.bf16.gmra.mxu0 %v809_v23  ;;  %v826_v23 = vld [vmem:[#allocation8] sm:$0xff]  }
  0x66   :  { %285 = vmatprep.mubr.bf16.mxu0 %v943_v0 }
  0x67   :  { %742 = vmatpush3.bf16.msra.mxu0 %v1007_v33 }
  0x68   :  { %743 = vmatprep.subr.bf16.mxu0 %v824_v21 }
  0x6b   :  { %744 = vmatpush3.bf16.msra.mxu0 %v824_v21 }
  0x6c   :  { %745 = vmatprep.subr.bf16.mxu0 %v825_v22 }
  0x6d   :  { %286 = vmatmul.mubr.bf16.gmra.mxu0 %v810_v24 }
  0x6f   :  { %746 = vmatpush3.bf16.msra.mxu0 %v825_v22 }
  0x70   :  { %747 = vmatprep.subr.bf16.mxu0 %v826_v23 }
  0x73   :  { %748 = vmatpush3.bf16.msra.mxu0 %v826_v23 }
 0x115   :  { %v257_v40 = vpop.f32.mrf.mxu0 }
 0x116   :  { %v258_v42 = vadd.f32 %v257_v40, %v112_v38 }
 0x117   :  { %v259_v41 = vpop.f32.mrf.mxu0 }
 0x118   :  { %v296_v47 = vmax.f32 %v258_v42, 0.0  ;;  %v260_v48 = vadd.f32 %v259_v41, %v1015_v43 }
 0x119   :  { %v261_v44 = vpop.f32.mrf.mxu0 }
 0x11a   :  { %v262_v45 = vadd.f32 %v261_v44, %v112_v38 }
 0x11b   :  { %v263_v46 = vpop.f32.mrf.mxu0 }
 0x11c   :  { %v297_v49 = vmax.f32 %v262_v45, 0.0  ;;  %v264_v50 = vadd.f32 %v263_v46, %v1015_v43 }
 0x11d   :  { %v267_v51 = vpop.f32.mrf.mxu0 }
 0x11e   :  { %v1019_v52 = vpack.c.bf16 %v264_v50, %v260_v48  ;;  %v304_v53 = vpack.c.bf16 %v297_v49, %v296_v47  ;;  %v268_v55 = vadd.f32 %v267_v51, %v112_v38 }
 0x11f   :  { %v269_v54 = vpop.f32.mrf.mxu0 }
 0x120   :  { %725 = vmatprep.mubr.bf16.mxu1 %v304_v53  ;;  %v298_v59 = vmax.f32 %v268_v55, 0.0  ;;  %v270_v60 = vadd.f32 %v269_v54, %v1015_v43 }
 0x121   :  { %v271_v56 = vpop.f32.mrf.mxu0 }
 0x122   :  { %v272_v57 = vadd.f32 %v271_v56, %v112_v38  ;;  %v676_v56 = vld [vmem:[%s1064_s6] ss:$0 sm:$0xff]  ;;  %s944_s6 = smov [#allocation10]  }
 0x123   :  { %v273_v58 = vpop.f32.mrf.mxu0  ;;  %s633_s25 = sshll.u32 %s944_s6, 4  ;;  %s634_s25 = int_to_ptr.vmem [resolvable:$true] %s633_s25 }
 0x124   :  { %v299_v61 = vmax.f32 %v272_v57, 0.0  ;;  %v274_v62 = vadd.f32 %v273_v58, %v1015_v43  ;;  %s907_s26 = scalar_lea.vmem %s634_s25, 1024  ;;  %p912_p7 = scmp.lt.s32.totalorder %s634_s25, %s634_s25 }
 0x125   :  { %v277_v63 = vpop.f32.mrf.mxu0  ;;  %p908_p6 = scmp.ne.s32.totalorder %s634_s25, %s907_s26  ;;  %p913_p8 = scmp.lt.s32.totalorder %s907_s26, %s907_s26 }
 0x126   :  { %v305_v0 = vpack.c.bf16 %v299_v61, %v298_v59  ;;  %v1023_v1 = vpack.c.bf16 %v274_v62, %v270_v60  ;;  %v278_v3 = vadd.f32 %v277_v63, %v112_v38 }
 0x127   :  { %v279_v2 = vpop.f32.mrf.mxu0  ;;  %p914_p9 = por %p913_p8, %p912_p7 }
 0x128   :  { %726 = vmatmul.mubr.bf16.vlgmr.msra.gmra.mxu1 %v305_v0  ;;  %v300_v7 = vmax.f32 %v278_v3, 0.0  ;;  %v280_v8 = vadd.f32 %v279_v2, %v1015_v43  ;;  %v606_v60 = vunpack.c.l.bf16 %v1023_v1  ;;  %v604_v0 = vunpack.c.l.bf16 %v1019_v52 }
 0x129   :  { %v281_v4 = vpop.f32.mrf.mxu0  ;;  %765 = vmatpush3.bf16.msra.mxu1 %v819_v29  ;;  %p915_p10 = pnand %p914_p9, %p908_p6 }
 0x12a   :  { %v282_v5 = vadd.f32 %v281_v4, %v112_v38  ;;  %758 = vmatprep.subr.bf16.mxu1 %v820_v30 }
 0x12b   :  { %v283_v6 = vpop.f32.mrf.mxu0 }
 0x12c   :  { %v301_v9 = vmax.f32 %v282_v5, 0.0  ;;  %v284_v10 = vadd.f32 %v283_v6, %v1015_v43  ;;  %v607_v6 = vunpack.c.h.bf16 %v1023_v1 }
 0x12d   :  { %v287_v11 = vpop.f32.mrf.mxu0  ;;  %766 = vmatpush3.bf16.msra.mxu1 %v820_v30 }
 0x12e   :  { %v306_v12 = vpack.c.bf16 %v301_v9, %v300_v7  ;;  %v1027_v13 = vpack.c.bf16 %v284_v10, %v280_v8  ;;  %759 = vmatprep.subr.bf16.mxu1 %v1000_v31  ;;  %v288_v15 = vadd.f32 %v287_v11, %v112_v38  ;;  %v605_v10 = vunpack.c.h.bf16 %v1019_v52 }
 0x12f   :  { %v1030_v14 = vpop.f32.mrf.mxu0 }
 0x130   :  { %729 = vmatprep.mubr.bf16.mxu1 %v306_v12  ;;  %v302_v18 = vmax.f32 %v288_v15, 0.0  ;;  %v608_v52 = vunpack.c.l.bf16 %v1027_v13 }
 0x131   :  { %v291_v16 = vpop.f32.mrf.mxu0  ;;  %767 = vmatpush3.bf16.msra.mxu1 %v1000_v31 }
 0x132   :  { %v292_v17 = vadd.f32 %v291_v16, %v112_v38  ;;  %760 = vmatprep.subr.bf16.mxu1 %v1003_v32 }
 0x133   :  { %v293_v55 = vpop.f32.mrf.mxu0 }
 0x134   :  { %v303_v19 = vmax.f32 %v292_v17, 0.0  ;;  %v294_v15 = vadd.f32 %v293_v55, %v1015_v43  ;;  %v290_v17 = vadd.f32 %v1030_v14, %v1015_v43  ;;  %v609_v14 = vunpack.c.h.bf16 %v1027_v13 }
 0x135   :  { %768 = vmatpush3.bf16.msra.mxu1 %v1003_v32 }
 0x136   :  { %v307_v20 = vpack.c.bf16 %v303_v19, %v302_v18  ;;  %761 = vmatprep.subr.bf16.mxu1 %v1007_v33  ;;  %v311_v18 = vpack.c.bf16 %v294_v15, %v290_v17 }
 0x138   :  { %730 = vmatmul.mubr.bf16.gmra.mxu1 %v307_v20 }
 0x139   :  { %769 = vmatpush3.bf16.msra.mxu1 %v1007_v33 }
 0x13a   :  { %762 = vmatprep.subr.bf16.mxu1 %v824_v21 }
 0x13d   :  { %770 = vmatpush3.bf16.msra.mxu1 %v824_v21  ;;  %v610_v21 = vunpack.c.l.bf16 %v311_v18 }
 0x13e   :  { %763 = vmatprep.subr.bf16.mxu1 %v825_v22 }
 0x141   :  { %771 = vmatpush3.bf16.msra.mxu1 %v825_v22 }
 0x142   :  { %764 = vmatprep.subr.bf16.mxu1 %v826_v23 }
 0x145   :  { %772 = vmatpush3.bf16.msra.mxu1 %v826_v23 }
 0x1e8   :  { %v727_v24 = vpop.f32.mrf.mxu1 }
 0x1e9   :  { %v426_v30 = vadd.f32 %v727_v24, %v667_v26 }
 0x1ea   :  { %v417_v25 = vpop.f32.mrf.mxu1 }
 0x1eb   :  { %v418_v28 = vadd.f32 %v667_v26, %v417_v25  ;;  %v450_v36 = vmax.f32 %v426_v30, 0.0 }
 0x1ec   :  { %v728_v27 = vpop.f32.mrf.mxu1 }
 0x1ed   :  { %v429_v29 = vadd.f32 %v728_v27, %v667_v26  ;;  %v448_v34 = vmax.f32 %v418_v28, 0.0 }
 0x1ee   :  { %v420_v31 = vpop.f32.mrf.mxu1 }
 0x1ef   :  { %v421_v32 = vadd.f32 %v667_v26, %v420_v31  ;;  %v451_v33 = vmax.f32 %v429_v29, 0.0  ;;  %v611_v29 = vunpack.c.h.bf16 %v311_v18 }
 0x1f1   :  { %v449_v35 = vmax.f32 %v421_v32, 0.0  ;;  %v457_v38 = vpack.c.bf16 %v451_v33, %v450_v36 }
 0x1f3   :  { %v456_v37 = vpack.c.bf16 %v449_v35, %v448_v34 }
 0x1f5   :  { %749 = vmatprep.mubr.bf16.mxu0 %v456_v37 }
 0x1f6   :  { %750 = vmatmul.mubr.bf16.vlgmr.msra.gmra.mxu0 %v457_v38 }
 0x1f8   :  { %v731_v39 = vpop.f32.mrf.mxu1 }
 0x1f9   :  { %v442_v45 = vadd.f32 %v731_v39, %v667_v26 }
 0x1fa   :  { %v433_v40 = vpop.f32.mrf.mxu1 }
 0x1fb   :  { %v434_v42 = vadd.f32 %v667_v26, %v433_v40  ;;  %v454_v51 = vmax.f32 %v442_v45, 0.0 }
 0x1fc   :  { %v732_v41 = vpop.f32.mrf.mxu1 }
 0x1fd   :  { %v445_v44 = vadd.f32 %v732_v41, %v667_v26  ;;  %v452_v49 = vmax.f32 %v434_v42, 0.0 }
 0x1fe   :  { %v436_v46 = vpop.f32.mrf.mxu1 }
 0x1ff   :  { %v437_v47 = vadd.f32 %v667_v26, %v436_v46  ;;  %v455_v48 = vmax.f32 %v445_v44, 0.0 }
 0x201   :  { %v453_v50 = vmax.f32 %v437_v47, 0.0  ;;  %v459_v54 = vpack.c.bf16 %v455_v48, %v454_v51 }
 0x203   :  { %v458_v53 = vpack.c.bf16 %v453_v50, %v452_v49 }
 0x205   :  { %753 = vmatprep.mubr.bf16.mxu1 %v458_v53 }
 0x206   :  { %754 = vmatmul.mubr.bf16.vlgmr.msra.gmra.mxu1 %v459_v54 }
 0x2b6   :  { %v751_v57 = vpop.f32.mrf.mxu0 }
 0x2b7   :  { %v574_v58 = vadd.f32 %v751_v57, %v676_v56 }
 0x2b8   :  { %v565_v59 = vpop.f32.mrf.mxu0 }
 0x2b9   :  { %v598_v61 = vmax.f32 %v574_v58, 0.0  ;;  %v566_v62 = vadd.f32 %v676_v56, %v565_v59 }
 0x2ba   :  { %v752_v63 = vpop.f32.mrf.mxu0 }
 0x2bb   :  { %v614_v2 = vadd.f32 %v606_v60, %v598_v61  ;;  %v596_v3 = vmax.f32 %v566_v62, 0.0  ;;  %v577_v4 = vadd.f32 %v752_v63, %v676_v56 }
 0x2bc   :  { %v568_v5 = vpop.f32.mrf.mxu0 }
 0x2bd   :  { %622 = vst [vmem:[#allocation10 + $0x10] sm:$0xff] %v614_v2  ;;  %v612_v7 = vadd.f32 %v604_v0, %v596_v3  ;;  %v599_v8 = vmax.f32 %v577_v4, 0.0  ;;  %v569_v9 = vadd.f32 %v676_v56, %v568_v5 }
 0x2bf   :  { %620 = vst [vmem:[#allocation10] sm:$0xff] %v612_v7  ;;  %v615_v11 = vadd.f32 %v607_v6, %v599_v8  ;;  %v597_v12 = vmax.f32 %v569_v9, 0.0 }
 0x2c1   :  { %623 = vst [vmem:[#allocation10 + $0x18] sm:$0xff] %v615_v11  ;;  %v613_v16 = vadd.f32 %v605_v10, %v597_v12 }
 0x2c3   :  { %621 = vst [vmem:[#allocation10 + $0x8] sm:$0xff] %v613_v16 }
 0x2c6   :  { %v755_v19 = vpop.f32.mrf.mxu1 }
 0x2c7   :  { %v590_v1 = vadd.f32 %v755_v19, %v676_v56 }
 0x2c8   :  { %v581_v20 = vpop.f32.mrf.mxu1 }
 0x2c9   :  { %v602_v22 = vmax.f32 %v590_v1, 0.0  ;;  %v582_v23 = vadd.f32 %v676_v56, %v581_v20 }
 0x2ca   :  { %v756_v24 = vpop.f32.mrf.mxu1 }
 0x2cb   :  { %v618_v25 = vadd.f32 %v610_v21, %v602_v22  ;;  %v600_v26 = vmax.f32 %v582_v23, 0.0  ;;  %v593_v27 = vadd.f32 %v756_v24, %v676_v56 }
 0x2cc   :  { %v584_v28 = vpop.f32.mrf.mxu1 }
 0x2cd   :  { %626 = vst [vmem:[#allocation10 + $0x30] sm:$0xff] %v618_v25  ;;  %v616_v30 = vadd.f32 %v608_v52, %v600_v26  ;;  %v603_v31 = vmax.f32 %v593_v27, 0.0  ;;  %v585_v43 = vadd.f32 %v676_v56, %v584_v28 }
 0x2cf   :  { %624 = vst [vmem:[#allocation10 + $0x20] sm:$0xff] %v616_v30  ;;  %v619_v32 = vadd.f32 %v611_v29, %v603_v31  ;;  %v601_v33 = vmax.f32 %v585_v43, 0.0 }
 0x2d1   :  { %627 = vst [vmem:[#allocation10 + $0x38] sm:$0xff] %v619_v32  ;;  %v617_v34 = vadd.f32 %v609_v14, %v601_v33 }
 0x2d3   :  { %625 = vst [vmem:[#allocation10 + $0x28] sm:$0xff] %v617_v34 }
 0x2d4   :  { %918 = shalt.err (!%p915_p10)
}
 0x2d5   :  { %639 = dma.vmem_to_hbm [thread:$0]  %s634_s25, 1024, %s1065_s7, [#allocation4], %s936_s27, %s936_s27, %s937_s28  }
 0x2d6   :  { %933 = dma.done.wait [#allocation4], 1024  }
 0x2d7   :  { %934 = vsyncadd [#allocation4], 4294966272 }
 0x2d8   :  { %643 = vsyncpa [#allocation3], 1 }
 0x2d9   :  { %644 = vsyncpa [#allocation6], 1 }
 0x2da   :  { %645 = vsyncpa [#allocation9], 1 }
 0x2db   :  { %646 = vsyncpa [#allocation4], 1 }

</bundles_post_ra>
